<compile_context>
chip_gen: v7x
topology: tpu7x:2x2x1
jax: 0.10.0
libtpu: 0.0.40
codegen_flags: <defaults>
</compile_context>

<pallas_src>
import functools
import math

import jax
import jax.numpy as jnp
from jax import lax
from jax.experimental import pallas as pl
from jax.experimental.pallas import tpu as pltpu

EPS = 1e-5  # nn.LayerNorm default


# --------------------------------------------------------------------------------------
# Kernel
# --------------------------------------------------------------------------------------
def _layernorm2d_kernel(x_ref, g_ref, b_ref, o_ref):
    # x_ref: (1, C, TN) block. Normalize over channels (sublane axis), independently for
    # each lane (spatial position). Two passes over the block: (1) moments, (2) output.
    x = x_ref[0].astype(jnp.float32)                      # (C, TN) f32 working copy
    mean = jnp.mean(x, axis=0, keepdims=True)             # (1, TN)
    mean_sq = jnp.mean(x * x, axis=0, keepdims=True)      # (1, TN)
    var = jnp.maximum(mean_sq - mean * mean, 0.0)         # biased variance (torch LayerNorm)
    inv = lax.rsqrt(var + EPS)                            # EUP op, (1, TN)

    # gamma/beta are (C, 1): applied after the per-lane normalization so each (C,1)
    # operand is broadcast exactly once against an already-(C,TN) value.
    g = g_ref[...].astype(jnp.float32)                    # (C, 1)
    b = b_ref[...].astype(jnp.float32)                    # (C, 1)
    o_ref[0] = ((x - mean) * inv * g + b).astype(o_ref.dtype)


# --------------------------------------------------------------------------------------
# Tiling / VMEM heuristics
# --------------------------------------------------------------------------------------
@functools.lru_cache(maxsize=1)
def _vmem_capacity_bytes():
    try:
        return int(pltpu.get_tpu_info().vmem_capacity_bytes)
    except Exception:
        return 64 << 20  # conservative fallback (v7x-sized VMEM)


def _pick_tile_n(n, c, dtype):
    """Lane tile: full spatial extent if it fits the budget, else a big multiple of 512."""
    itemsize = jnp.dtype(dtype).itemsize
    vmem_cap = _vmem_capacity_bytes()
    # HBM-traffic target per block in the NATIVE dtype: 8 MiB on 128-MiB-VMEM parts
    # (v5e/v6e), 4 MiB on 64-MiB-VMEM parts (v7x).
    target_hbm = (8 << 20) if vmem_cap >= (100 << 20) else (4 << 20)
    # Separate VMEM cap: ~2x double-buffered in + out (native dtype) + ~3 f32 temps/elem.
    per_elem_vmem = 4 * itemsize + 3 * 4
    max_elems = min(target_hbm // itemsize, int(vmem_cap * 0.6) // per_elem_vmem)
    if n * c <= max_elems:
        return int(n)
    lanes = (max_elems // c) // 512 * 512
    return int(max(512, lanes))


def _vmem_limit_bytes(c, tile_n, itemsize):
    block = c * tile_n
    need = 4 * block * itemsize + 3 * block * 4       # dbl-buffered in/out + f32 temps
    need = int(need * 1.25) + (2 << 20)                # headroom + compiler scratch slack
    cap = int(_vmem_capacity_bytes() * 0.9)            # never request ~all of physical VMEM
    return max(min(need, cap), 32 << 20)


# --------------------------------------------------------------------------------------
# Wrapper
# --------------------------------------------------------------------------------------
@functools.partial(jax.jit, static_argnames=("tile_n",))
def _layer_norm_2d_impl(x3, g2, b2, tile_n):
    B, C, N = x3.shape
    itemsize = jnp.dtype(x3.dtype).itemsize
    return pl.pallas_call(
        _layernorm2d_kernel,
        out_shape=jax.ShapeDtypeStruct((B, C, N), x3.dtype),
        grid_spec=pltpu.PrefetchScalarGridSpec(
            num_scalar_prefetch=0,
            grid=(B, pl.cdiv(N, tile_n)),
            in_specs=[
                pl.BlockSpec((1, C, tile_n), lambda b, i: (b, 0, i)),
                pl.BlockSpec((C, 1), lambda b, i: (0, 0)),   # grid-invariant, stays resident
                pl.BlockSpec((C, 1), lambda b, i: (0, 0)),
            ],
            out_specs=pl.BlockSpec((1, C, tile_n), lambda b, i: (b, 0, i)),
        ),
        compiler_params=pltpu.CompilerParams(
            dimension_semantics=("parallel", "parallel"),
            vmem_limit_bytes=_vmem_limit_bytes(C, tile_n, itemsize),
        ),
    )(x3, g2, b2)


def layer_norm_2d(x_nchw, gamma, beta, *, tile_n=None):
    """x_nchw: (B, C, H, W). gamma/beta: (C,). Returns (B, C, H, W)."""
    B, C, H, W = x_nchw.shape
    N = H * W
    if tile_n is None:
        tile_n = _pick_tile_n(N, C, x_nchw.dtype)
    tile_n = min(int(tile_n), N)

    # Guarantee >= 2 grid steps on a "parallel" axis so both v7x TensorCores get work
    # (only possible when N > 128, since tiles must be multiples of 128 or the full dim).
    if B * math.ceil(N / tile_n) < 2 and N > 128:
        half = ((N + 1) // 2 + 127) // 128 * 128
        tile_n = min(tile_n, half)

    x3 = x_nchw.reshape(B, C, N)   # free: no data movement
    g2 = gamma.reshape(C, 1)
    b2 = beta.reshape(C, 1)
    out3 = _layer_norm_2d_impl(x3, g2, b2, tile_n)
    return out3.reshape(B, C, H, W)


# --------------------------------------------------------------------------------------
# Reference + self-test
# --------------------------------------------------------------------------------------
def _reference(x_nchw, gamma, beta):
    x = jnp.transpose(x_nchw, (0, 2, 3, 1)).astype(jnp.float32)
    mean = jnp.mean(x, axis=-1, keepdims=True)
    var = jnp.mean((x - mean) ** 2, axis=-1, keepdims=True)
    y = (x - mean) / jnp.sqrt(var + EPS) * gamma + beta
    return jnp.transpose(y, (0, 3, 1, 2)).astype(x_nchw.dtype)


if __name__ == "__main__":
    key = jax.random.PRNGKey(0)
    kx, kg, kb, kx2, kx3 = jax.random.split(key, 5)

    # Main check: B=2, C=32 (embed_dim), 16x16 spatial.
    B, C, H, W = 2, 32, 16, 16
    x = jax.random.normal(kx, (B, C, H, W), dtype=jnp.float32)
    gamma = 1.0 + 0.1 * jax.random.normal(kg, (C,), dtype=jnp.float32)
    beta = 0.1 * jax.random.normal(kb, (C,), dtype=jnp.float32)

    out = jax.block_until_ready(layer_norm_2d(x, gamma, beta))
    ref = _reference(x, gamma, beta)
    assert out.shape == (B, C, H, W)
    assert jnp.allclose(out, ref, atol=1e-5, rtol=1e-5), float(jnp.max(jnp.abs(out - ref)))

    # Second check: multi-block grid with a partial last block (N=130, tile_n=128)
    # to exercise the cdiv / masked-boundary path.
    H2, W2 = 10, 13
    x2 = jax.random.normal(kx2, (B, C, H2, W2), dtype=jnp.float32)
    out2 = jax.block_until_ready(layer_norm_2d(x2, gamma, beta, tile_n=128))
    ref2 = _reference(x2, gamma, beta)
    assert out2.shape == (B, C, H2, W2)
    assert jnp.allclose(out2, ref2, atol=1e-5, rtol=1e-5), float(jnp.max(jnp.abs(out2 - ref2)))

    # Third check: B=1 path where the whole spatial extent would fit one block; the
    # wrapper must split it into >=2 parallel grid steps (megacore coverage on v7x).
    H3, W3 = 32, 32
    x3 = jax.random.normal(kx3, (1, C, H3, W3), dtype=jnp.float32)
    out3 = jax.block_until_ready(layer_norm_2d(x3, gamma, beta))
    ref3 = _reference(x3, gamma, beta)
    assert out3.shape == (1, C, H3, W3)
    assert jnp.allclose(out3, ref3, atol=1e-5, rtol=1e-5), float(jnp.max(jnp.abs(out3 - ref3)))

    print("KERNEL_OK")
</pallas_src>

<mosaic_0001>
module attributes {stable_mosaic.version = 11 : i64} {
  func.func @_layernorm2d_kernel(%arg0: i32, %arg1: i32, %arg2: memref<1x32x256xf32, #tpu.memory_space<vmem>>, %arg3: memref<32x1xf32, #tpu.memory_space<vmem>>, %arg4: memref<32x1xf32, #tpu.memory_space<vmem>>, %arg5: memref<1x32x256xf32, #tpu.memory_space<vmem>>) attributes {dimension_semantics = [#tpu.dimension_semantics<parallel>, #tpu.dimension_semantics<parallel>], iteration_bounds = array<i64: 2, 1>, scalar_prefetch = 0 : i64, scratch_operands = 0 : i64, tpu.core_type = #tpu.core_type<tc>, window_params = [{transform_indices = @transform_0, window_bounds = array<i64: 1, 32, 256>}, {pipeline_mode = #tpu.pipeline_mode<synchronous>, transform_indices = @transform_1, window_bounds = array<i64: 32, 1>}, {pipeline_mode = #tpu.pipeline_mode<synchronous>, transform_indices = @transform_2, window_bounds = array<i64: 32, 1>}, {transform_indices = @transform_3, window_bounds = array<i64: 1, 32, 256>}]} {
    %c0 = arith.constant 0 : index
    %c0_0 = arith.constant 0 : index
    %c0_1 = arith.constant 0 : index
    %0 = vector.load %arg2[%c0, %c0_0, %c0_1] : memref<1x32x256xf32, #tpu.memory_space<vmem>>, vector<1x32x256xf32>
    %1 = vector.shape_cast %0 : vector<1x32x256xf32> to vector<32x256xf32>
    %cst = arith.constant dense<0.000000e+00> : vector<256xf32>
    %2 = vector.multi_reduction <add>, %1, %cst [0] : vector<32x256xf32> to vector<256xf32>
    %3 = vector.shape_cast %2 : vector<256xf32> to vector<1x256xf32>
    %cst_2 = arith.constant 3.200000e+01 : f32
    %4 = vector.broadcast %cst_2 : f32 to vector<1x256xf32>
    %5 = arith.divf %3, %4 : vector<1x256xf32>
    %6 = arith.mulf %1, %1 : vector<32x256xf32>
    %cst_3 = arith.constant dense<0.000000e+00> : vector<256xf32>
    %7 = vector.multi_reduction <add>, %6, %cst_3 [0] : vector<32x256xf32> to vector<256xf32>
    %8 = vector.shape_cast %7 : vector<256xf32> to vector<1x256xf32>
    %cst_4 = arith.constant 3.200000e+01 : f32
    %9 = vector.broadcast %cst_4 : f32 to vector<1x256xf32>
    %10 = arith.divf %8, %9 : vector<1x256xf32>
    %11 = arith.mulf %5, %5 : vector<1x256xf32>
    %12 = arith.subf %10, %11 : vector<1x256xf32>
    %cst_5 = arith.constant 0.000000e+00 : f32
    %13 = vector.broadcast %cst_5 : f32 to vector<1x256xf32>
    %14 = arith.maximumf %12, %13 : vector<1x256xf32>
    %cst_6 = arith.constant 9.99999974E-6 : f32
    %15 = vector.broadcast %cst_6 : f32 to vector<1x256xf32>
    %16 = arith.addf %14, %15 : vector<1x256xf32>
    %17 = math.rsqrt %16 : vector<1x256xf32>
    %c0_7 = arith.constant 0 : index
    %c0_8 = arith.constant 0 : index
    %18 = vector.load %arg3[%c0_7, %c0_8] : memref<32x1xf32, #tpu.memory_space<vmem>>, vector<32x1xf32>
    %c0_9 = arith.constant 0 : index
    %c0_10 = arith.constant 0 : index
    %19 = vector.load %arg4[%c0_9, %c0_10] : memref<32x1xf32, #tpu.memory_space<vmem>>, vector<32x1xf32>
    %20 = vector.broadcast %5 : vector<1x256xf32> to vector<32x256xf32>
    %21 = arith.subf %1, %20 : vector<32x256xf32>
    %22 = vector.broadcast %17 : vector<1x256xf32> to vector<32x256xf32>
    %23 = arith.mulf %21, %22 : vector<32x256xf32>
    %24 = vector.broadcast %18 : vector<32x1xf32> to vector<32x256xf32>
    %25 = arith.mulf %23, %24 : vector<32x256xf32>
    %26 = vector.broadcast %19 : vector<32x1xf32> to vector<32x256xf32>
    %27 = arith.addf %25, %26 : vector<32x256xf32>
    %c0_11 = arith.constant 0 : index
    %c0_12 = arith.constant 0 : index
    %c0_13 = arith.constant 0 : index
    %28 = vector.load %arg5[%c0_11, %c0_12, %c0_13] : memref<1x32x256xf32, #tpu.memory_space<vmem>>, vector<1x32x256xf32>
    %29 = vector.shape_cast %28 : vector<1x32x256xf32> to vector<32x256xf32>
    %30 = vector.shape_cast %27 : vector<32x256xf32> to vector<1x32x256xf32>
    tpu.vector_store %arg5[%c0_11, %c0_12, %c0_13], %30 {strides = array<i32>} : memref<1x32x256xf32, #tpu.memory_space<vmem>>, vector<1x32x256xf32>,
    return
  }
  func.func @transform_0(%arg0: i32, %arg1: i32) -> (i32, i32, i32) {
    %c0_i32 = arith.constant 0 : i32
    %c0_i32_0 = arith.constant 0 : i32
    return %arg0, %c0_i32, %arg1 : i32, i32, i32
  }
  func.func @transform_1(%arg0: i32, %arg1: i32) -> (i32, i32) {
    %c0_i32 = arith.constant 0 : i32
    %c0_i32_0 = arith.constant 0 : i32
    %c0_i32_1 = arith.constant 0 : i32
    return %c0_i32, %c0_i32_0 : i32, i32
  }
  func.func @transform_2(%arg0: i32, %arg1: i32) -> (i32, i32) {
    %c0_i32 = arith.constant 0 : i32
    %c0_i32_0 = arith.constant 0 : i32
    %c0_i32_1 = arith.constant 0 : i32
    return %c0_i32, %c0_i32_0 : i32, i32
  }
  func.func @transform_3(%arg0: i32, %arg1: i32) -> (i32, i32, i32) {
    %c0_i32 = arith.constant 0 : i32
    %c0_i32_0 = arith.constant 0 : i32
    return %arg0, %c0_i32, %arg1 : i32, i32, i32
  }
}

</mosaic_0001>

<bundles_post_ra>
// kernel: _layer_norm_2d_impl.1
= control target key start
LH: loop header
LB: loop body
LE: loop exit
PB: predicated region body
PF: predicated region fallthrough
CT: control target
= control target key end

     0   :  { %8 = vsyncpa [#allocation3], 0  ;;  %s959_s0 = inlined_call_operand.hbm [shape: f32[2,32,256], index: 0, kind: input, shape index: {}]   ;;  %s960_s1 = inlined_call_operand.vmem [shape: f32[32,1], index: 1, kind: input, shape index: {}]   ;;  %s961_s2 = inlined_call_operand.vmem [shape: f32[32,1], index: 2, kind: input, shape index: {}]   ;;  %s962_s3 = inlined_call_operand.hbm [shape: f32[2,32,256], index: 3, kind: output, shape index: {}]  }
   0x1   :  { %10 = vsyncpa [#allocation3 + $0x1], 0 }
   0x2   :  { %11 = vsyncpa [#allocation4], 0 }
   0x3   :  { %13 = vsyncpa [#allocation4 + $0x1], 0  ;;  %s698_s12 = smov 0   ;;  %s700_s13 = smov 0  }
   0x4   :  { %s702_s14 = smov 0   ;;  %s704_s15 = smov 0  }
   0x5   :  { %s706_s16 = smov 0   ;;  %s708_s17 = smov 0  }
   0x6 LB: > { %s467_s18 = sadd.s32 4294967295, %s669_s17   ;;  %s468_s19 = sadd.s32 4294967294, %s669_s17   ;;  %s669_s17 = sphi %s708_s17, %s19_s17   ;;  %s665_s16 = sphi %s706_s16, %s977_s16   ;;  %s661_s15 = sphi %s704_s15, %s976_s15   ;;  %s657_s14 = sphi %s702_s14, %s975_s14   ;;  %s653_s13 = sphi %s700_s13, %s974_s13   ;;  %s649_s12 = sphi %s698_s12, %s973_s12  }
   0x7   : > { %s31_s20 = sadd.s32 1, %s665_s16  ;;  %s40_s21 = sadd.s32 1, %s657_s14 }
   0x8   : > { %p33_p0 = scmp.ge.s32.totalorder %s31_s20, 2  ;;  %p47_p1 = scmp.ne.s32.totalorder %s657_s14, %s653_s13 }
   0x9   : > { %p48_p2 = scmp.eq.s32.totalorder %s669_s17, 0  ;;  %p53_p3 = scmp.ne.s32.totalorder %s653_s13, %s649_s12 }
   0xa   : > { %s979_s20 = smov (%p33_p0, %s31_s20), 0  ;;  %p54_p5 = scmp.eq.s32.totalorder %s467_s18, 0 }
   0xb   : > { %p739_p4 = por %p48_p2, %p47_p1  ;;  %s35_s23 = ssub.s32 %s665_s16, %s979_s20 }
   0xc   : > { %p121_p6 = scmp.eq.s32.totalorder %s467_s18, 1  ;;  %p38_p7 = scmp.eq.s32.totalorder %s35_s23, 0 }
   0xd   : > { %p745_p8 = por %p54_p5, %p53_p3  ;;  %p127_p10 = scmp.eq.s32.totalorder %s468_s19, 1 }
   0xe   : > { %p749_p9 = por %p121_p6, %p47_p1  ;;  %p496_p13 = scmp.lt.s32.totalorder %s669_s17, 2 }
   0xf   : > { %s754_s26 = scalar_select %p38_p7, %s657_s14, %s40_s21  }
  0x10   : > { %s966_s25 = scalar_select %p749_p9, 1, 0 }
  0x11   : > { %p756_p11 = por %p127_p10, %p53_p3  ;;  %s153_s28 = sand.u32 1, %s657_s14  }
  0x12   : > { %s471_s29 = sshll.u32 %s153_s28, 6  ;;  %s482_s30 = sshll.u32 %s665_s16, 10 }
  0x13   : > { %s967_s27 = scalar_select %p756_p11, 1, 0 }
  0x14   : > { %s767_s6 = scalar_lea.hbm %s959_s0, %s482_s30  ;;  %s157_s7 = scalar_lea.vmem [#allocation2], %s471_s29 }
  0x15   : > { %s166_s8 = sshll.u32 %s157_s7, 4  ;;  %p773_p0 = pnand %p496_p13, %p739_p4  ;;  %s769_s8 = int_to_ptr.vmem [resolvable:$true] %s166_s8 }
  0x16   : > { %s778_s10 = scalar_lea.sflag [#allocation3], %s153_s28  ;;  %s557_s11 = scalar_lea.hbm %s767_s6, 1024 }
  0x17   : > { %p558_p2 = scmp.ne.s32.totalorder %s767_s6, %s557_s11  ;;  %p559_p3 = pneg %p773_p0 }
  0x18   : > { %s562_s21 = scalar_lea.hbm %s959_s0, 2048  ;;  %p563_p4 = scmp.lt.u32.totalorder %s767_s6, %s959_s0 }
  0x19   : > { %p560_p5 = pnand %p559_p3, %p558_p2  ;;  %p564_p7 = scmp.lt.u32.totalorder %s562_s21, %s557_s11 }
  0x1a   : > { %p566_p13 = scmp.lt.u32.totalorder %s557_s11, %s767_s6 }
  0x1b   : > { %p561_p6 = pneg %p560_p5  ;;  %p565_p10 = por %p564_p7, %p563_p4 }
  0x1d   : > { %p567_p12 = por %p566_p13, %p565_p10 }
  0x1f   : > { %p568_p1 = pnand %p567_p12, %p561_p6 }
  0x21   : > { %571 = shalt.err (!%p568_p1)
}
  0x22   : > { %s572_s28 = scalar_lea.vmem %s769_s8, 1024  ;;  %s671_s29 = smov [#allocation2]  }
  0x23   : > { %p573_p2 = scmp.ne.s32.totalorder %s769_s8, %s572_s28  ;;  %s577_s30 = sshll.u32 %s671_s29, 4  ;;  %s578_s30 = int_to_ptr.vmem [resolvable:$false] %s577_s30 }
  0x24   : > { %s579_s4 = scalar_lea.vmem %s578_s30, 2048  ;;  %p580_p9 = scmp.lt.s32.totalorder %s769_s8, %s578_s30 }
  0x25   : > { %p575_p5 = pnand %p573_p2, %p559_p3  ;;  %p581_p4 = scmp.lt.s32.totalorder %s579_s4, %s572_s28 }
  0x27   : > { %p576_p11 = pneg %p575_p5  ;;  %p582_p7 = por %p581_p4, %p580_p9 }
  0x29   : > { %p583_p10 = pnand %p582_p7, %p576_p11 }
  0x2b   : > { %586 = shalt.err (!%p583_p10)
}
  0x2c   : > { %s672_s5 = smov 256   ;;  %s673_s7 = smov 16  }
  0x2d   : > { %491 = dma.hbm_to_vmem [thread:$0]  (!%p773_p0), %s767_s6, 1024, %s769_s8, %s778_s10, %s672_s5, %s672_s5, %s673_s7  }
  0x2e   : > { %p174_p12 = scmp.lt.s32.totalorder %s669_s17, 3  ;;  %p969_p1 = scmp.ge.s32.totalorder %s669_s17, 1 }
  0x30   : > { %p175_p3 = pnand %p969_p1, %p174_p12 }
  0x31   : > { %s810_s11 = sand.u32 (!%p175_p3), 1, %s653_s13  }
  0x32   : > { %178 = sbr.rel (%p175_p3) target bundleno = 218 (0xda), region = 32  ;;  %s475_s18 = sshll.u32 (!%p175_p3), %s810_s11, 6 }
  0x33   : > { %s181_s19 = scalar_lea.sflag (!%p175_p3), [#allocation3], %s810_s11  ;;  %s816_s21 = scalar_lea.vmem (!%p175_p3), [#allocation2], %s475_s18 }
  0x39   : > { %640 = dma.done.wait (%p745_p8), %s181_s19, 1024  }
  0x3a   : > { %642 = vsyncadd (%p745_p8), %s181_s19, 4294966272  ;;  %v674_v0 = vmov 0   ;;  %v278_v1 = vld [vmem:[%s960_s1 + $0x10] sm:$0xff]  ;;  %v276_v2 = vld [vmem:[%s960_s1] sm:$0xff]  ;;  %s483_s10 = sshll.u32 %s661_s15, 10  ;;  %s365_s23 = scalar_lea.sflag [#allocation4], %s810_s11 }
  0x3b   : > { %552 = vset.pattern.permute.xlu1 %v674_v0  ;;  %551 = vset.pattern.permute.xlu0 %v674_v0  ;;  %v279_v3 = vld [vmem:[%s960_s1 + $0x18] sm:$0xff]  ;;  %v277_v4 = vld [vmem:[%s960_s1 + $0x8] sm:$0xff]  ;;  %v280_v6 = vld [vmem:[%s961_s2] sm:$0xff]  ;;  %s910_s15 = scalar_lea.hbm %s962_s3, %s483_s10  ;;  %p970_p9 = scmp.ne.s32.totalorder %s966_s25, 0 }
  0x3c   : > { %312 = vperm.xlu1 %552, %v278_v1   ;;  %302 = vperm.xlu0 %551, %v276_v2   ;;  %v281_v5 = vld [vmem:[%s961_s2 + $0x8] sm:$0xff]  ;;  %v283_v7 = vld [vmem:[%s961_s2 + $0x18] sm:$0xff]  ;;  %v282_v8 = vld [vmem:[%s961_s2 + $0x10] sm:$0xff]  ;;  %s675_s28 = smov [#allocation5]  }
  0x3d   : > { %v847_v9 = vld [vmem:[%s816_s21] sm:$0xff]  ;;  %v850_v10 = vld [vmem:[%s816_s21 + $0x10] sm:$0xff]  ;;  %v853_v11 = vld [vmem:[%s816_s21 + $0x8] sm:$0xff]  ;;  %s591_s29 = sshll.u32 %s675_s28, 4  ;;  %s592_s29 = int_to_ptr.vmem [resolvable:$false] %s591_s29 }
  0x3e   : > { %v856_v12 = vld [vmem:[%s816_s21 + $0x18] sm:$0xff]  ;;  %v217_v13 = vadd.f32 %v850_v10, %v847_v9  ;;  %v238_v14 = vmul.f32 %v847_v9, %v847_v9  ;;  %v240_v15 = vmul.f32 %v850_v10, %v850_v10  ;;  %v865_v16 = vld [vmem:[%s816_s21 + $0x20] sm:$0xff]  ;;  %v239_v18 = vmul.f32 %v853_v11, %v853_v11  ;;  %v874_v20 = vld [vmem:[%s816_s21 + $0x28] sm:$0xff]  ;;  %s593_s30 = scalar_lea.vmem %s592_s29, 2048 }
  0x3f   : > { %v226_v17 = vadd.f32 %v856_v12, %v853_v11  ;;  %v241_v19 = vmul.f32 %v856_v12, %v856_v12  ;;  %v242_v22 = vmul.f32 %v865_v16, %v865_v16  ;;  %v880_v24 = vld [vmem:[%s816_s21 + $0x30] sm:$0xff]  ;;  %v243_v26 = vmul.f32 %v874_v20, %v874_v20  ;;  %v886_v28 = vld [vmem:[%s816_s21 + $0x38] sm:$0xff]  ;;  %s206_s21 = scalar_lea.vmem [#allocation5], %s475_s18 }
  0x40   : > { %317 = vperm.xlu1 %552, %v279_v3   ;;  %307 = vperm.xlu0 %551, %v277_v4   ;;  %v218_v21 = vadd.f32 %v217_v13, %v865_v16  ;;  %v246_v23 = vadd.f32 %v240_v15, %v238_v14  ;;  %v244_v30 = vmul.f32 %v880_v24, %v880_v24  ;;  %s380_s9 = sshll.u32 %s206_s21, 4  ;;  %s905_s9 = int_to_ptr.vmem [resolvable:$true] %s380_s9 }
  0x41   : > { %v227_v25 = vadd.f32 %v226_v17, %v874_v20  ;;  %v255_v27 = vadd.f32 %v241_v19, %v239_v18  ;;  %v245_v33 = vmul.f32 %v886_v28, %v886_v28  ;;  %s587_s24 = scalar_lea.vmem %s905_s9, 1024  ;;  %p594_p6 = scmp.lt.s32.totalorder %s905_s9, %s592_s29 }
  0x42   : > { %v219_v29 = vadd.f32 %v218_v21, %v880_v24  ;;  %v247_v31 = vadd.f32 %v246_v23, %v242_v22  ;;  %p588_p8 = scmp.ne.s32.totalorder %s905_s9, %s587_s24  ;;  %p595_p13 = scmp.lt.s32.totalorder %s593_s30, %s587_s24 }
  0x43   : > { %v228_v32 = vadd.f32 %v227_v25, %v886_v28  ;;  %v256_v34 = vadd.f32 %v255_v27, %v243_v26 }
  0x44   : > { %335 = vperm.xlu1 %552, %v281_v5   ;;  %330 = vperm.xlu0 %551, %v280_v6   ;;  %v220_v35 = vrot.slane %v219_v29, 4  ;;  %v248_v36 = vadd.f32 %v247_v31, %v244_v30  ;;  %p589_p11 = pnand %p588_p8, %p970_p9  ;;  %p596_p2 = por %p595_p13, %p594_p6 }
  0x45   : > { %v229_v37 = vrot.slane %v228_v32, 4  ;;  %v257_v38 = vadd.f32 %v256_v34, %v245_v33 }
  0x46   : > { %v221_v39 = vadd.f32 %v220_v35, %v219_v29  ;;  %v249_v40 = vrot.slane %v248_v36, 4  ;;  %p590_p0 = pneg %p589_p11 }
  0x47   : > { %v230_v41 = vadd.f32 %v229_v37, %v228_v32  ;;  %v258_v42 = vrot.slane %v257_v38, 4 }
  0x48   : > { %345 = vperm.xlu1 %552, %v283_v7   ;;  %340 = vperm.xlu0 %551, %v282_v8   ;;  %v222_v43 = vrot.slane %v221_v39, 2  ;;  %v250_v44 = vadd.f32 %v249_v40, %v248_v36  ;;  %p597_p5 = pnand %p596_p2, %p590_p0 }
  0x49   : > { %v231_v45 = vrot.slane %v230_v41, 2  ;;  %v259_v46 = vadd.f32 %v258_v42, %v257_v38 }
  0x4a   : > { %v223_v47 = vadd.f32 %v222_v43, %v221_v39  ;;  %v251_v48 = vrot.slane %v250_v44, 2 }
  0x4b   : > { %v232_v49 = vadd.f32 %v231_v45, %v230_v41  ;;  %v260_v50 = vrot.slane %v259_v46, 2 }
  0x4c   : > { %v224_v51 = vrot.slane %v223_v47, 1  ;;  %v252_v52 = vadd.f32 %v251_v48, %v250_v44 }
  0x4d   : > { %v233_v53 = vrot.slane %v232_v49, 1  ;;  %v261_v54 = vadd.f32 %v260_v50, %v259_v46 }
  0x4e   : > { %v225_v55 = vadd.f32 %v224_v51, %v223_v47  ;;  %v253_v56 = vrot.slane %v252_v52, 1 }
  0x4f   : > { %v234_v57 = vadd.f32 %v233_v53, %v232_v49  ;;  %v262_v58 = vrot.slane %v261_v54, 1 }
  0x50   : > { %v236_v59 = vmul.f32 0.03125, %v225_v55  ;;  %v254_v60 = vadd.f32 %v253_v56, %v252_v52 }
  0x51   : > { %v237_v61 = vmul.f32 0.03125, %v234_v57  ;;  %v263_v62 = vadd.f32 %v262_v58, %v261_v54 }
  0x52   : > { %v264_v63 = vmul.f32 0.03125, %v254_v60  ;;  %v266_v0 = vmul.f32 %v236_v59, %v236_v59  ;;  %v284_v14 = vsub.f32 %v847_v9, %v236_v59  ;;  %v286_v17 = vsub.f32 %v850_v10, %v236_v59 }
  0x53   : > { %v265_v1 = vmul.f32 0.03125, %v263_v62  ;;  %v267_v2 = vmul.f32 %v237_v61, %v237_v61  ;;  %v285_v15 = vsub.f32 %v853_v11, %v237_v61  ;;  %v287_v18 = vsub.f32 %v856_v12, %v237_v61 }
  0x54   : > { %v268_v3 = vsub.f32 %v264_v63, %v266_v0  ;;  %v288_v23 = vsub.f32 %v865_v16, %v236_v59  ;;  %v289_v25 = vsub.f32 %v874_v20, %v237_v61  ;;  %v290_v26 = vsub.f32 %v880_v24, %v236_v59 }
  0x55   : > { %v269_v4 = vsub.f32 %v265_v1, %v267_v2  ;;  %v291_v27 = vsub.f32 %v886_v28, %v237_v61 }
  0x56   : > { %v270_v5 = vmax.f32 %v268_v3, 0.0 }
  0x57   : > { %v271_v6 = vmax.f32 %v269_v4, 0.0 }
  0x58   : > { %v272_v7 = vadd.f32 1e-05, %v270_v5 }
  0x59   : > { %v273_v8 = vadd.f32 1e-05, %v271_v6 }
  0x5a   : > { %553 = vrsqrt.f32 %v272_v7 }
  0x5b   : > { %555 = vrsqrt.f32 %v273_v8 }
  0x64   : > { %v554_v13 = vpop.eup %553 }
  0x65   : > { %v556_v19 = vpop.eup %555  ;;  %v292_v29 = vmul.f32 %v554_v13, %v284_v14  ;;  %v294_v30 = vmul.f32 %v554_v13, %v286_v17  ;;  %v296_v32 = vmul.f32 %v554_v13, %v288_v23  ;;  %v298_v33 = vmul.f32 %v554_v13, %v290_v26 }
  0x66   : > { %v293_v9 = vmul.f32 %v556_v19, %v285_v15  ;;  %v295_v11 = vmul.f32 %v556_v19, %v287_v18  ;;  %v297_v12 = vmul.f32 %v556_v19, %v289_v25  ;;  %v299_v34 = vmul.f32 %v556_v19, %v291_v27 }
  0xbb   : > { %v313_v21 = vpop.permute.xlu1 %312  ;;  %v303_v22 = vpop.permute.xlu0 %302 }
  0xbc   : > { %v320_v35 = vmul.f32 %v303_v22, %v292_v29  ;;  %v321_v16 = vmul.f32 %v303_v22, %v293_v9  ;;  %v324_v41 = vmul.f32 %v313_v21, %v296_v32  ;;  %v325_v42 = vmul.f32 %v313_v21, %v297_v12 }
  0xbf   : > { %v318_v31 = vpop.permute.xlu1 %317  ;;  %v308_v10 = vpop.permute.xlu0 %307 }
  0xc0   : > { %v322_v36 = vmul.f32 %v308_v10, %v294_v30  ;;  %v323_v20 = vmul.f32 %v308_v10, %v295_v11  ;;  %v326_v43 = vmul.f32 %v318_v31, %v298_v33  ;;  %v327_v44 = vmul.f32 %v318_v31, %v299_v34 }
  0xc3   : > { %v336_v24 = vpop.permute.xlu1 %335  ;;  %v331_v28 = vpop.permute.xlu0 %330 }
  0xc4   : > { %v350_v37 = vadd.f32 %v336_v24, %v322_v36  ;;  %v351_v38 = vadd.f32 %v336_v24, %v323_v20  ;;  %v348_v39 = vadd.f32 %v331_v28, %v320_v35  ;;  %v349_v40 = vadd.f32 %v331_v28, %v321_v16 }
  0xc6   : > { %358 = vst [vmem:[%s206_s21 + $0x10] sm:$0xff] %v350_v37  ;;  %359 = vst [vmem:[%s206_s21 + $0x18] sm:$0xff] %v351_v38 }
  0xc7   : > { %356 = vst [vmem:[%s206_s21] sm:$0xff] %v348_v39  ;;  %357 = vst [vmem:[%s206_s21 + $0x8] sm:$0xff] %v349_v40  ;;  %v346_v45 = vpop.permute.xlu1 %345  ;;  %v341_v46 = vpop.permute.xlu0 %340 }
  0xc8   : > { %v354_v47 = vadd.f32 %v346_v45, %v326_v43  ;;  %v355_v48 = vadd.f32 %v346_v45, %v327_v44  ;;  %v352_v49 = vadd.f32 %v341_v46, %v324_v41  ;;  %v353_v50 = vadd.f32 %v341_v46, %v325_v42 }
  0xca   : > { %362 = vst [vmem:[%s206_s21 + $0x30] sm:$0xff] %v354_v47  ;;  %363 = vst [vmem:[%s206_s21 + $0x38] sm:$0xff] %v355_v48 }
  0xcb   : > { %360 = vst [vmem:[%s206_s21 + $0x20] sm:$0xff] %v352_v49  ;;  %361 = vst [vmem:[%s206_s21 + $0x28] sm:$0xff] %v353_v50 }
  0xcc   : > { %600 = shalt.err (!%p597_p5)
}
  0xcd   : > { %s601_s4 = scalar_lea.hbm %s910_s15, 1024  ;;  %s605_s19 = scalar_lea.hbm %s962_s3, 2048 }
  0xce   : > { %p602_p4 = scmp.ne.s32.totalorder %s910_s15, %s601_s4  ;;  %p606_p12 = scmp.lt.u32.totalorder %s910_s15, %s962_s3 }
  0xcf   : > { %p607_p1 = scmp.lt.u32.totalorder %s605_s19, %s601_s4  ;;  %p609_p8 = scmp.lt.u32.totalorder %s601_s4, %s910_s15 }
  0xd0   : > { %p603_p7 = pnand %p602_p4, %p970_p9 }
  0xd1   : > { %p608_p3 = por %p607_p1, %p606_p12 }
  0xd2   : > { %p604_p10 = pneg %p603_p7 }
  0xd3   : > { %p610_p11 = por %p609_p8, %p608_p3 }
  0xd5   : > { %p611_p0 = pnand %p610_p11, %p604_p10 }
  0xd7   : > { %614 = shalt.err (!%p611_p0)
}
  0xd8   : > { %s676_s21 = smov 256   ;;  %s677_s10 = smov 16  }
  0xd9   : > { %486 = dma.vmem_to_hbm [thread:$0]  (%p970_p9), %s905_s9, 1024, %s910_s15, %s365_s23, %s676_s21, %s676_s21, %s677_s10  }
  0xda PF: > { %s395_s18 = sand.u32 1, %s649_s12   ;;  %p971_p6 = scmp.ne.s32.totalorder %s967_s27, 0 }
  0xdb   : > { %p972_p13 = scmp.ge.s32.totalorder %s669_s17, 2  ;;  %s396_s22 = scalar_lea.sflag [#allocation4], %s395_s18 }
  0xdd   : > { %p493_p2 = pnand %p972_p13, %p971_p6 }
  0xdf   : > { %644 = dma.done.wait (!%p493_p2), %s396_s22, 1024  }
  0xe0   : > { %646 = vsyncadd (!%p493_p2), %s396_s22, 4294966272  ;;  %s19_s17 = sadd.s32 1, %s669_s17   ;;  %s973_s12 = smov %s653_s13 }
  0xe1   : > { %p16_p5 = scmp.ge.s32.totalorder %s19_s17, 4   ;;  %s974_s13 = smov %s657_s14 }
  0xe2   : > { %s975_s14 = smov %s754_s26  ;;  %s976_s15 = smov %s665_s16 }
  0xe3   : > { %s977_s16 = smov %s979_s20  ;;  %18 = sbr.rel (!%p16_p5) target bundleno = 6 (0x6), region = 77 }
  0xea   :  { %401 = vsyncpa [#allocation3], 1 }
  0xeb   :  { %403 = vsyncpa [#allocation3 + $0x1], 1 }
  0xec   :  { %404 = vsyncpa [#allocation4], 1 }
  0xed   :  { %406 = vsyncpa [#allocation4 + $0x1], 1 }

</bundles_post_ra>
